<compile_context>
chip_gen: v6e
topology: v6e:2x2x1
jax: 0.10.0
libtpu: 0.0.40
codegen_flags: <defaults>
</compile_context>

<pallas_src>
import functools

import jax
import jax.numpy as jnp
from jax import lax
from jax.experimental import pallas as pl
from jax.experimental.pallas import tpu as pltpu


# Per perf review: when N2_pad is small (128-256) and per-step MXU work is
# short, the (TM, TK) patch DMA can become exposed; raising this to 3 requests
# a third patch buffer (pl.Buffered) at the cost of one extra TM*TK*2-byte
# block.  Left at the default double-buffering; sweep 2 vs 3 per layer shape.
_PATCH_PIPELINE_DEPTH = 2


def _round_up(x, m):
    return ((x + m - 1) // m) * m


def _vmem_capacity_bytes():
    """Physical VMEM of the local TPU; conservative 64 MiB (v7x) fallback."""
    try:
        info = pltpu.get_tpu_info()
        for name in ("vmem_capacity_bytes", "vmem_size_bytes", "vmem_bytes"):
            val = getattr(info, name, None)
            if val:
                return int(val)
    except Exception:
        pass
    return 64 * 1024 * 1024


def _largest_tile(dim_pad, cap):
    """Largest multiple of 128 that divides dim_pad (a multiple of 128), <= cap."""
    m = dim_pad // 128
    best = 1
    d = 1
    while d * d <= m:
        if m % d == 0:
            for c in (d, m // d):
                if 128 * c <= cap and c > best:
                    best = c
        d += 1
    return 128 * best


# ----------------------------- Pallas kernel ------------------------------ #
def _complex_mm_kernel(p_ref, w_ref, b_ref, o_ref):
    """One (TM, TN) tile of the fused complex matmul.

    p_ref : (TM, TK)  bf16  [pr | pi] patch slab (K order: tap, complex, chan)
    w_ref : (TK, TN)  bf16  matching block of [[wr, wi], [-wi, wr]]
    b_ref : (1,  TN)  f32   [b_re | b_im] slice
    o_ref : (TM, TN)  f32   revisited across the K grid axis -> accumulator

    The output block's index_map is constant along the (innermost) K axis, so
    it stays resident in VMEM: initialize it with the broadcast bias at the
    first K step and accumulate MXU partials straight into it (no scratch).
    Padded output columns only ever receive the zero-padded bias; the wrapper
    slices them off, they are never read.
    """
    kk = pl.program_id(2)

    @pl.when(kk == 0)
    def _init():
        o_ref[...] = jnp.broadcast_to(b_ref[...], o_ref.shape)

    o_ref[...] += jnp.dot(p_ref[...], w_ref[...],
                          preferred_element_type=jnp.float32)


def _complex_matmul_pallas(patches, w_blk, bias):
    """patches (M, K2) bf16 @ w_blk (K2, N2) + bias (N2,) -> (M, N2) f32."""
    M, K2 = patches.shape
    _, N2 = w_blk.shape

    vmem_cap = _vmem_capacity_bytes()
    big_vmem = vmem_cap >= 100 * 1024 * 1024   # v5e / v6e: 128 MiB, single TC

    # Lane-dense, 128-multiple tiles; TK/TN chosen as divisors of the padded
    # extents so the contraction axis is not over-padded.
    K2_pad = _round_up(K2, 128)
    N2_pad = _round_up(N2, 128)
    TK = _largest_tile(K2_pad, 1024 if big_vmem else 512)
    TN = _largest_tile(N2_pad, 512)

    # Row tiling: big tiles amortize the ~0.35us/step grid overhead and halve
    # weight-block re-reads, but on v7x (64 MiB VMEM, 2 TCs) keep TM<=256 so
    # >=2 parallel M tiles can shard across the TensorCores.
    M128 = _round_up(M, 128)
    if big_vmem and M128 >= 2048:
        TM = 512
    elif M128 >= 512:
        TM = 256
    else:
        TM = 128
    M_pad = _round_up(M, TM)

    p = jnp.pad(patches, ((0, M_pad - M), (0, K2_pad - K2)))               # bf16
    w = jnp.pad(w_blk, ((0, K2_pad - K2), (0, N2_pad - N2))).astype(jnp.bfloat16)
    b = jnp.pad(bias, (0, N2_pad - N2)).astype(jnp.float32).reshape(1, N2_pad)

    grid = (M_pad // TM, N2_pad // TN, K2_pad // TK)

    # Explicit scoped-VMEM budget from the per-step footprint (double-buffered
    # inputs + the revisited f32 output block) with generous headroom:
    # v5e's default scoped limit is only 16 MiB; v7x has 64 MiB physical.
    vmem_need = (_PATCH_PIPELINE_DEPTH * TM * TK * 2   # bf16 patch buffers
                 + 2 * TK * TN * 2                     # bf16 weight buffers
                 + 2 * 8 * TN * 4                      # f32 bias buffers (sublane-padded)
                 + 2 * TM * TN * 4)                    # f32 output block + write buffer
    vmem_limit = int(min(max(2 * vmem_need, 32 * 1024 * 1024),
                         vmem_cap - 2 * 1024 * 1024))

    if _PATCH_PIPELINE_DEPTH != 2 and TN <= 256:
        patch_spec = pl.BlockSpec((TM, TK), lambda i, j, kk: (i, kk),
                                  pipeline_mode=pl.Buffered(_PATCH_PIPELINE_DEPTH))
    else:
        patch_spec = pl.BlockSpec((TM, TK), lambda i, j, kk: (i, kk))

    cost = pl.CostEstimate(
        flops=2 * M_pad * K2_pad * N2_pad,
        transcendentals=0,
        bytes_accessed=(M_pad * K2_pad * 2 * (N2_pad // TN)    # patches per N tile
                        + K2_pad * N2_pad * 2 * (M_pad // TM)  # weights per M tile
                        + N2_pad * 4
                        + M_pad * N2_pad * 4),
    )

    out = pl.pallas_call(
        _complex_mm_kernel,
        out_shape=jax.ShapeDtypeStruct((M_pad, N2_pad), jnp.float32),
        grid_spec=pltpu.PrefetchScalarGridSpec(
            num_scalar_prefetch=0,
            grid=grid,
            in_specs=[
                patch_spec,
                pl.BlockSpec((TK, TN), lambda i, j, kk: (kk, j)),
                pl.BlockSpec((1, TN), lambda i, j, kk: (0, j)),
            ],
            out_specs=pl.BlockSpec((TM, TN), lambda i, j, kk: (i, j)),
        ),
        compiler_params=pltpu.CompilerParams(
            dimension_semantics=("parallel", "parallel", "arbitrary"),
            vmem_limit_bytes=vmem_limit),
        cost_estimate=cost,
    )(p, w, b)

    return out[:M, :N2]


# --------------------------- glue (plain JAX) ------------------------------ #
# TODO(synk): top remaining review item is fusing patch extraction into the
# kernel (implicit-GEMM over an HBM-resident NHWC band) so the k^2-expanded
# patch matrix never touches HBM; kept as the single-pass XLA im2col below for
# robustness across arbitrary channel counts / strides.
def _im2col_complex_nhwc(x, k, stride, padding):
    """x: (B, 2, C, H, W) -> bf16 patches (B*Ho*Wo, k*k*2C), K = (tap, cplx, chan)."""
    B, two, C, H, W = x.shape
    # One cheap relayout of the small (pre-expansion) input: complex-major
    # channels moved minor (NHWC) and cast to bf16, so every tap slice below
    # is already (B, Ho, Wo, 2C) and the stack+reshape is layout-free.
    xc = jnp.transpose(x.reshape(B, two * C, H, W), (0, 2, 3, 1)).astype(jnp.bfloat16)
    if padding > 0:
        xc = jnp.pad(xc, ((0, 0), (padding, padding), (padding, padding), (0, 0)))
    Hp, Wp = xc.shape[1], xc.shape[2]
    Ho = (Hp - k) // stride + 1
    Wo = (Wp - k) // stride + 1
    taps = [xc[:, i:i + stride * Ho:stride, j:j + stride * Wo:stride, :]
            for i in range(k) for j in range(k)]
    patches = jnp.stack(taps, axis=3)                       # (B, Ho, Wo, k*k, 2C)
    patches = patches.reshape(B * Ho * Wo, k * k * two * C)
    return patches, Ho, Wo


def _build_weight_block(w_re, w_im):
    """OIHW real/imag weights -> (k*k*2*C_in, 2*C_out) block matrix.

    Row order matches the im2col K order (tap, complex, channel); columns are
    [y_re | y_im], so ONE matmul computes
      [pr | pi] @ [[wr, wi], [-wi, wr]] = [pr@wr - pi@wi | pr@wi + pi@wr].
    """
    C_out, C_in, kh, kw = w_re.shape
    wr = jnp.transpose(w_re, (2, 3, 1, 0)).reshape(kh * kw, C_in, C_out)
    wi = jnp.transpose(w_im, (2, 3, 1, 0)).reshape(kh * kw, C_in, C_out)
    top = jnp.concatenate([wr, wi], axis=2)       # real-channel rows
    bot = jnp.concatenate([-wi, wr], axis=2)      # imag-channel rows
    w_blk = jnp.concatenate([top, bot], axis=1)   # (k*k, 2*C_in, 2*C_out)
    return w_blk.reshape(kh * kw * 2 * C_in, 2 * C_out)


def _complex_conv_xla(x, w_re, w_im, b_re, b_im, stride, padding):
    """Plain-XLA complex conv (reference + tiny-layer fallback path)."""
    x_re, x_im = x[:, 0], x[:, 1]

    def conv(inp, w):
        return lax.conv_general_dilated(
            inp, w, window_strides=(stride, stride),
            padding=[(padding, padding), (padding, padding)],
            dimension_numbers=("NCHW", "OIHW", "NCHW"))

    y_re = conv(x_re, w_re) - conv(x_im, w_im) + b_re.reshape(1, -1, 1, 1)
    y_im = conv(x_im, w_re) + conv(x_re, w_im) + b_im.reshape(1, -1, 1, 1)
    return jnp.stack([y_re, y_im], axis=1)


def _pallas_worthwhile(M, K2, N2):
    # Tiny layers (narrow C_out / small spatial extent): the MXU tile would be
    # mostly zero padding and fixed per-step cost dominates -> XLA conv wins.
    return M >= 512 and K2 >= 128 and N2 >= 64


def complex_conv_forward(x, w_re, w_im, b_re, b_im, stride=1, padding=0,
                         use_pallas=None):
    """x: (B, 2, C_in, H, W); weights in PyTorch OIHW layout; returns f32."""
    B, _, C_in, H, W = x.shape
    C_out, _, kh, kw = w_re.shape
    assert kh == kw, "square kernels only"
    k = kh
    Ho = (H + 2 * padding - k) // stride + 1
    Wo = (W + 2 * padding - k) // stride + 1
    M, K2, N2 = B * Ho * Wo, 2 * C_in * k * k, 2 * C_out

    if use_pallas is None:
        use_pallas = _pallas_worthwhile(M, K2, N2)
    if not use_pallas:
        return _complex_conv_xla(x, w_re, w_im, b_re, b_im, stride, padding)

    patches, Ho, Wo = _im2col_complex_nhwc(x, k, stride, padding)   # (M, K2) bf16
    w_blk = _build_weight_block(w_re, w_im)                         # (K2, N2)
    bias = jnp.concatenate([b_re, b_im])                            # (N2,)

    out = _complex_matmul_pallas(patches, w_blk, bias)              # (M, N2) f32
    # [re | im] columns are contiguous -> one reshape + one transpose suffice.
    return out.reshape(B, Ho, Wo, 2, C_out).transpose(0, 3, 4, 1, 2)


# -------------------------------- main ------------------------------------- #
if __name__ == "__main__":
    B, C_in, H, W = 2, 4, 16, 16
    C_out, k, stride, padding = 4, 3, 1, 0

    key = jax.random.PRNGKey(0)
    kx, kwr, kwi, kbr, kbi = jax.random.split(key, 5)

    x = jax.random.normal(kx, (B, 2, C_in, H, W), dtype=jnp.float32)
    fan_in = C_in * k * k
    bound = 1.0 / (fan_in ** 0.5)
    w_re = jax.random.uniform(kwr, (C_out, C_in, k, k), jnp.float32, -bound, bound)
    w_im = jax.random.uniform(kwi, (C_out, C_in, k, k), jnp.float32, -bound, bound)
    b_re = jax.random.uniform(kbr, (C_out,), jnp.float32, -bound, bound)
    b_im = jax.random.uniform(kbi, (C_out,), jnp.float32, -bound, bound)

    # Force the Pallas path at demo size (auto-dispatch would route this tiny
    # layer to the XLA conv fallback, per the review's tiny-layer heuristic).
    fwd = jax.jit(functools.partial(complex_conv_forward, stride=stride,
                                    padding=padding, use_pallas=True))
    y = fwd(x, w_re, w_im, b_re, b_im)
    jax.block_until_ready(y)

    y_ref = _complex_conv_xla(x, w_re, w_im, b_re, b_im, stride, padding)
    assert y.shape == (B, 2, C_out, H - k + 1, W - k + 1), y.shape

    # bf16 patches/weights with f32 accumulation: fan-in-scaled tolerance.
    K2 = 2 * C_in * k * k
    scale = float(jnp.max(jnp.abs(y_ref)))
    err = float(jnp.max(jnp.abs(y - y_ref)))
    tol = (2e-2 + 2e-2 * scale) * max(1.0, (K2 / 72.0) ** 0.5)
    assert err <= tol, (err, tol)

    # Auto-dispatch (tiny layer -> XLA fallback) must agree with the reference.
    y_auto = complex_conv_forward(x, w_re, w_im, b_re, b_im, stride, padding)
    assert jnp.allclose(y_auto, y_ref, atol=1e-5, rtol=1e-5)

    print("KERNEL_OK")
</pallas_src>

<mosaic_0001>
module attributes {stable_mosaic.version = 11 : i64} {
  func.func @_complex_mm_kernel(%arg0: i32, %arg1: i32, %arg2: i32, %arg3: memref<256x128xbf16, #tpu.memory_space<vmem>>, %arg4: memref<128x128xbf16, #tpu.memory_space<vmem>>, %arg5: memref<1x128xf32, #tpu.memory_space<vmem>>, %arg6: memref<256x128xf32, #tpu.memory_space<vmem>>) attributes {dimension_semantics = [#tpu.dimension_semantics<parallel>, #tpu.dimension_semantics<parallel>, #tpu.dimension_semantics<arbitrary>], iteration_bounds = array<i64: 2, 1, 1>, scalar_prefetch = 0 : i64, scratch_operands = 0 : i64, tpu.core_type = #tpu.core_type<tc>, window_params = [{transform_indices = @transform_0, window_bounds = array<i64: 256, 128>}, {transform_indices = @transform_1, window_bounds = array<i64: 128, 128>}, {transform_indices = @transform_2, window_bounds = array<i64: 1, 128>}, {transform_indices = @transform_3, window_bounds = array<i64: 256, 128>}]} {
    %c0_i32 = arith.constant 0 : i32
    %0 = arith.cmpi eq, %arg2, %c0_i32 : i32
    %1 = arith.extui %0 : i1 to i32
    %c0_i32_0 = arith.constant 0 : i32
    %2 = arith.cmpi ne, %1, %c0_i32_0 : i32
    scf.if %2 {
      %c0_8 = arith.constant 0 : index
      %c0_9 = arith.constant 0 : index
      %9 = vector.load %arg5[%c0_8, %c0_9] : memref<1x128xf32, #tpu.memory_space<vmem>>, vector<1x128xf32>
      %10 = vector.shape_cast %9 : vector<1x128xf32> to vector<1x128xf32>
      %11 = vector.broadcast %10 : vector<1x128xf32> to vector<256x128xf32>
      %c0_10 = arith.constant 0 : index
      %c0_11 = arith.constant 0 : index
      %12 = vector.load %arg6[%c0_10, %c0_11] : memref<256x128xf32, #tpu.memory_space<vmem>>, vector<256x128xf32>
      tpu.vector_store %arg6[%c0_10, %c0_11], %11 {strides = array<i32>} : memref<256x128xf32, #tpu.memory_space<vmem>>, vector<256x128xf32>,
    } else {
    }
    %c0 = arith.constant 0 : index
    %c0_1 = arith.constant 0 : index
    %3 = vector.load %arg6[%c0, %c0_1] : memref<256x128xf32, #tpu.memory_space<vmem>>, vector<256x128xf32>
    %c0_2 = arith.constant 0 : index
    %c0_3 = arith.constant 0 : index
    %4 = vector.load %arg3[%c0_2, %c0_3] : memref<256x128xbf16, #tpu.memory_space<vmem>>, vector<256x128xbf16>
    %c0_4 = arith.constant 0 : index
    %c0_5 = arith.constant 0 : index
    %5 = vector.load %arg4[%c0_4, %c0_5] : memref<128x128xbf16, #tpu.memory_space<vmem>>, vector<128x128xbf16>
    %cst = arith.constant dense<0.000000e+00> : vector<256x128xf32>
    %6 = tpu.matmul %4, %5, %cst {dimension_numbers = #tpu.dot_dimension_numbers<[1], [0], [0], [1], [0, 0, 1, 1], [], []>} : vector<256x128xbf16>, vector<128x128xbf16>, vector<256x128xf32> -> vector<256x128xf32>
    %7 = arith.addf %3, %6 : vector<256x128xf32>
    %c0_6 = arith.constant 0 : index
    %c0_7 = arith.constant 0 : index
    %8 = vector.load %arg6[%c0_6, %c0_7] : memref<256x128xf32, #tpu.memory_space<vmem>>, vector<256x128xf32>
    tpu.vector_store %arg6[%c0_6, %c0_7], %7 {strides = array<i32>} : memref<256x128xf32, #tpu.memory_space<vmem>>, vector<256x128xf32>,
    return
  }
  func.func @transform_0(%arg0: i32, %arg1: i32, %arg2: i32) -> (i32, i32) {
    %c0_i32 = arith.constant 0 : i32
    return %arg0, %arg2 : i32, i32
  }
  func.func @transform_1(%arg0: i32, %arg1: i32, %arg2: i32) -> (i32, i32) {
    %c0_i32 = arith.constant 0 : i32
    return %arg2, %arg1 : i32, i32
  }
  func.func @transform_2(%arg0: i32, %arg1: i32, %arg2: i32) -> (i32, i32) {
    %c0_i32 = arith.constant 0 : i32
    %c0_i32_0 = arith.constant 0 : i32
    return %c0_i32, %arg1 : i32, i32
  }
  func.func @transform_3(%arg0: i32, %arg1: i32, %arg2: i32) -> (i32, i32) {
    %c0_i32 = arith.constant 0 : i32
    return %arg0, %arg1 : i32, i32
  }
}

</mosaic_0001>

<bundles_post_ra>
// kernel: complex_conv_forward.1
= control target key start
LH: loop header
LB: loop body
LE: loop exit
PB: predicated region body
PF: predicated region fallthrough
CT: control target
= control target key end

     0   :  { %s1081_s12 = smov 0   ;;  %s1083_s13 = smov 0   ;;  %s1231_s0 = inlined_call_operand.vmem [shape: bf16[512,128], index: 0, kind: input, shape index: {}]   ;;  %s1232_s1 = inlined_call_operand.vmem [shape: bf16[128,128], index: 1, kind: input, shape index: {}]   ;;  %s1233_s2 = inlined_call_operand.vmem [shape: f32[1,128], index: 2, kind: input, shape index: {}]   ;;  %s1234_s3 = inlined_call_operand.vmem [shape: f32[512,128], index: 3, kind: output, shape index: {}]  }
   0x1   :  { %s1085_s14 = smov 0  }
   0x2 LB: > { %s32_s15 = sadd.s32 1, %s1055_s13  ;;  %p869_p0 = scmp.ge.s32.totalorder %s1059_s14, 1  ;;  %s1059_s14 = sphi %s1085_s14, %s13_s14   ;;  %s1055_s13 = sphi %s1083_s13, %s1236_s13   ;;  %s1051_s12 = sphi %s1081_s12, %s1235_s12  }
   0x3   : > { %p34_p1 = scmp.ge.s32.totalorder %s32_s15, 2  ;;  %p188_p2 = scmp.lt.s32.totalorder %s1059_s14, 3 }
   0x5   : > { %s1238_s15 = smov (%p34_p1, %s32_s15), 0  ;;  %p189_p3 = pnand %p869_p0, %p188_p2 }
   0x6   : > { %s870_s18 = sshll.u32 (!%p189_p3), %s1051_s12, 5 }
   0x7   : > { %192 = sbr.rel (%p189_p3) target bundleno = 271 (0x10f), region = 32  ;;  %p230_p4 = scmp.lt.s32.totalorder (!%p189_p3), %s870_s18, 63 }
   0xc   : > { %v1013_v0 = vld [vmem:[%s1232_s1 + $0x38] sm:$0xff]   ;;  %v1014_v1 = vld [vmem:[%s1232_s1 + $0x30] sm:$0xff]   ;;  %s1240_s18 = smov (!%p230_p4, %s870_s18), 63  ;;  %v1015_v2 = vld [vmem:[%s1232_s1 + $0x28] sm:$0xff]  }
   0xd   : > { %925 = vmatprep.subr.bf16.mxu0 %v1013_v0  ;;  %973 = vmatprep.subr.bf16.mxu1 %v1013_v0  ;;  %s871_s23 = sshll.u32 %s1240_s18, 2  ;;  %v1016_v3 = vld [vmem:[%s1232_s1 + $0x20] sm:$0xff]   ;;  %v1017_v6 = vld [vmem:[%s1232_s1 + $0x18] sm:$0xff]   ;;  %v1018_v7 = vld [vmem:[%s1232_s1 + $0x10] sm:$0xff]   ;;  %s873_s10 = sshll.u32 %s1240_s18, 3 }
   0xe   : > { %926 = vmatpush3.bf16.msra.mxu0 %v1013_v0  ;;  %981 = vmatpush3.bf16.msra.mxu1 %v1013_v0  ;;  %s1114_s26 = scalar_lea.vmem %s1231_s0, %s871_s23  ;;  %v1019_v8 = vld [vmem:[%s1232_s1 + $0x8] sm:$0xff]   ;;  %v1020_v9 = vld [vmem:[%s1232_s1] sm:$0xff]   ;;  %s1156_s19 = scalar_lea.vmem %s1234_s3, %s873_s10 }
   0xf   : > { %927 = vmatprep.subr.bf16.mxu0 %v1014_v1  ;;  %974 = vmatprep.subr.bf16.mxu1 %v1014_v1  ;;  %v1021_v4 = vld [vmem:[%s1114_s26] sm:$0xff]   ;;  %v1023_v10 = vld [vmem:[%s1114_s26 + $0x8] sm:$0xff]   ;;  %v1025_v12 = vld [vmem:[%s1114_s26 + $0x10] sm:$0xff]  }
  0x10   : > { %v1022_v5 = vld [vmem:[%s1114_s26 + $0x40] sm:$0xff]   ;;  %941 = vmatprep.mubr.bf16.mxu0 %v1021_v4  ;;  %v1024_v11 = vld [vmem:[%s1114_s26 + $0x48] sm:$0xff]   ;;  %v1026_v13 = vld [vmem:[%s1114_s26 + $0x50] sm:$0xff]  }
  0x11   : > { %957 = vmatprep.mubr.bf16.mxu1 %v1022_v5  ;;  %v1027_v14 = vld [vmem:[%s1114_s26 + $0x18] sm:$0xff]   ;;  %v1029_v16 = vld [vmem:[%s1114_s26 + $0x20] sm:$0xff]   ;;  %v1031_v18 = vld [vmem:[%s1114_s26 + $0x28] sm:$0xff]  }
  0x12   : > { %928 = vmatpush3.bf16.msra.mxu0 %v1014_v1  ;;  %982 = vmatpush3.bf16.msra.mxu1 %v1014_v1  ;;  %v1028_v15 = vld [vmem:[%s1114_s26 + $0x58] sm:$0xff]   ;;  %v1030_v17 = vld [vmem:[%s1114_s26 + $0x60] sm:$0xff]   ;;  %v1032_v19 = vld [vmem:[%s1114_s26 + $0x68] sm:$0xff]  }
  0x13   : > { %929 = vmatprep.subr.bf16.mxu0 %v1015_v2  ;;  %975 = vmatprep.subr.bf16.mxu1 %v1015_v2  ;;  %v1033_v20 = vld [vmem:[%s1114_s26 + $0x30] sm:$0xff]   ;;  %v1035_v22 = vld [vmem:[%s1114_s26 + $0x38] sm:$0xff]   ;;  %v1151_v24 = vld [vmem:[%s1233_s2] ss:$0 sm:$0xff] }
  0x14   : > { %v1034_v21 = vld [vmem:[%s1114_s26 + $0x70] sm:$0xff]   ;;  %v1036_v23 = vld [vmem:[%s1114_s26 + $0x78] sm:$0xff]  }
  0x16   : > { %930 = vmatpush3.bf16.msra.mxu0 %v1015_v2  ;;  %983 = vmatpush3.bf16.msra.mxu1 %v1015_v2 }
  0x17   : > { %931 = vmatprep.subr.bf16.mxu0 %v1016_v3  ;;  %976 = vmatprep.subr.bf16.mxu1 %v1016_v3 }
  0x1a   : > { %932 = vmatpush3.bf16.msra.mxu0 %v1016_v3  ;;  %984 = vmatpush3.bf16.msra.mxu1 %v1016_v3 }
  0x1b   : > { %933 = vmatprep.subr.bf16.mxu0 %v1017_v6  ;;  %977 = vmatprep.subr.bf16.mxu1 %v1017_v6 }
  0x1e   : > { %934 = vmatpush3.bf16.msra.mxu0 %v1017_v6  ;;  %985 = vmatpush3.bf16.msra.mxu1 %v1017_v6 }
  0x1f   : > { %935 = vmatprep.subr.bf16.mxu0 %v1018_v7  ;;  %978 = vmatprep.subr.bf16.mxu1 %v1018_v7 }
  0x22   : > { %936 = vmatpush3.bf16.msra.mxu0 %v1018_v7  ;;  %986 = vmatpush3.bf16.msra.mxu1 %v1018_v7 }
  0x23   : > { %937 = vmatprep.subr.bf16.mxu0 %v1019_v8  ;;  %979 = vmatprep.subr.bf16.mxu1 %v1019_v8 }
  0x26   : > { %938 = vmatpush3.bf16.msra.mxu0 %v1019_v8  ;;  %987 = vmatpush3.bf16.msra.mxu1 %v1019_v8 }
  0x27   : > { %939 = vmatprep.subr.bf16.mxu0 %v1020_v9  ;;  %980 = vmatprep.subr.bf16.mxu1 %v1020_v9 }
  0x2a   : > { %940 = vmatpush3.bf16.msra.mxu0 %v1020_v9  ;;  %988 = vmatpush3.bf16.msra.mxu1 %v1020_v9 }
  0x2d   : > { %942 = vmatmul.mubr.bf16.vlgmr.msra.gmra.mxu0 %v1023_v10  ;;  %958 = vmatmul.mubr.bf16.vlgmr.msra.gmra.mxu1 %v1024_v11 }
  0x2e   : > { %945 = vmatprep.mubr.bf16.mxu0 %v1025_v12  ;;  %961 = vmatprep.mubr.bf16.mxu1 %v1026_v13 }
  0x35   : > { %946 = vmatmul.mubr.bf16.gmra.mxu0 %v1027_v14  ;;  %962 = vmatmul.mubr.bf16.gmra.mxu1 %v1028_v15 }
  0x36   : > { %949 = vmatprep.mubr.bf16.mxu0 %v1029_v16  ;;  %965 = vmatprep.mubr.bf16.mxu1 %v1030_v17 }
  0x3d   : > { %950 = vmatmul.mubr.bf16.gmra.mxu0 %v1031_v18  ;;  %966 = vmatmul.mubr.bf16.gmra.mxu1 %v1032_v19 }
  0x3e   : > { %953 = vmatprep.mubr.bf16.mxu0 %v1033_v20  ;;  %969 = vmatprep.mubr.bf16.mxu1 %v1034_v21 }
  0x45   : > { %954 = vmatmul.mubr.bf16.gmra.mxu0 %v1035_v22  ;;  %970 = vmatmul.mubr.bf16.gmra.mxu1 %v1036_v23 }
  0xed   : > { %v943_v25 = vpop.f32.mrf.mxu0  ;;  %v959_v26 = vpop.f32.mrf.mxu1 }
  0xee   : > { %v690_v27 = vadd.f32 %v943_v25, %v1151_v24  ;;  %v706_v28 = vadd.f32 %v959_v26, %v1151_v24 }
  0xef   : > { %v561_v29 = vpop.f32.mrf.mxu0  ;;  %v625_v30 = vpop.f32.mrf.mxu1 }
  0xf0   : > { %722 = vst [vmem:[%s1156_s19 + $0x10] sm:$0xff] %v690_v27  ;;  %738 = vst [vmem:[%s1156_s19 + $0x90] sm:$0xff] %v706_v28  ;;  %v688_v31 = vadd.f32 %v1151_v24, %v561_v29  ;;  %v704_v32 = vadd.f32 %v1151_v24, %v625_v30 }
  0xf1   : > { %v944_v33 = vpop.f32.mrf.mxu0  ;;  %v960_v34 = vpop.f32.mrf.mxu1 }
  0xf2   : > { %720 = vst [vmem:[%s1156_s19] sm:$0xff] %v688_v31  ;;  %736 = vst [vmem:[%s1156_s19 + $0x80] sm:$0xff] %v704_v32  ;;  %v691_v35 = vadd.f32 %v944_v33, %v1151_v24  ;;  %v707_v36 = vadd.f32 %v960_v34, %v1151_v24 }
  0xf3   : > { %v564_v37 = vpop.f32.mrf.mxu0  ;;  %v628_v38 = vpop.f32.mrf.mxu1 }
  0xf4   : > { %723 = vst [vmem:[%s1156_s19 + $0x18] sm:$0xff] %v691_v35  ;;  %739 = vst [vmem:[%s1156_s19 + $0x98] sm:$0xff] %v707_v36  ;;  %v689_v39 = vadd.f32 %v1151_v24, %v564_v37  ;;  %v705_v40 = vadd.f32 %v1151_v24, %v628_v38 }
  0xf5   : > { %v947_v41 = vpop.f32.mrf.mxu0  ;;  %v963_v42 = vpop.f32.mrf.mxu1 }
  0xf6   : > { %721 = vst [vmem:[%s1156_s19 + $0x8] sm:$0xff] %v689_v39  ;;  %737 = vst [vmem:[%s1156_s19 + $0x88] sm:$0xff] %v705_v40  ;;  %v694_v43 = vadd.f32 %v947_v41, %v1151_v24  ;;  %v710_v44 = vadd.f32 %v963_v42, %v1151_v24 }
  0xf7   : > { %v577_v45 = vpop.f32.mrf.mxu0  ;;  %v641_v46 = vpop.f32.mrf.mxu1 }
  0xf8   : > { %726 = vst [vmem:[%s1156_s19 + $0x30] sm:$0xff] %v694_v43  ;;  %742 = vst [vmem:[%s1156_s19 + $0xb0] sm:$0xff] %v710_v44  ;;  %v692_v47 = vadd.f32 %v1151_v24, %v577_v45  ;;  %v708_v48 = vadd.f32 %v1151_v24, %v641_v46 }
  0xf9   : > { %v948_v49 = vpop.f32.mrf.mxu0  ;;  %v964_v50 = vpop.f32.mrf.mxu1 }
  0xfa   : > { %724 = vst [vmem:[%s1156_s19 + $0x20] sm:$0xff] %v692_v47  ;;  %740 = vst [vmem:[%s1156_s19 + $0xa0] sm:$0xff] %v708_v48  ;;  %v695_v51 = vadd.f32 %v948_v49, %v1151_v24  ;;  %v711_v52 = vadd.f32 %v964_v50, %v1151_v24 }
  0xfb   : > { %v580_v53 = vpop.f32.mrf.mxu0  ;;  %v644_v54 = vpop.f32.mrf.mxu1 }
  0xfc   : > { %727 = vst [vmem:[%s1156_s19 + $0x38] sm:$0xff] %v695_v51  ;;  %743 = vst [vmem:[%s1156_s19 + $0xb8] sm:$0xff] %v711_v52  ;;  %v693_v55 = vadd.f32 %v1151_v24, %v580_v53  ;;  %v709_v56 = vadd.f32 %v1151_v24, %v644_v54 }
  0xfd   : > { %v951_v57 = vpop.f32.mrf.mxu0  ;;  %v967_v58 = vpop.f32.mrf.mxu1 }
  0xfe   : > { %725 = vst [vmem:[%s1156_s19 + $0x28] sm:$0xff] %v693_v55  ;;  %741 = vst [vmem:[%s1156_s19 + $0xa8] sm:$0xff] %v709_v56  ;;  %v698_v59 = vadd.f32 %v951_v57, %v1151_v24  ;;  %v714_v60 = vadd.f32 %v967_v58, %v1151_v24 }
  0xff   : > { %v593_v61 = vpop.f32.mrf.mxu0  ;;  %v657_v62 = vpop.f32.mrf.mxu1 }
 0x100   : > { %730 = vst [vmem:[%s1156_s19 + $0x50] sm:$0xff] %v698_v59  ;;  %746 = vst [vmem:[%s1156_s19 + $0xd0] sm:$0xff] %v714_v60  ;;  %v696_v63 = vadd.f32 %v1151_v24, %v593_v61  ;;  %v712_v0 = vadd.f32 %v1151_v24, %v657_v62 }
 0x101   : > { %v952_v1 = vpop.f32.mrf.mxu0  ;;  %v968_v2 = vpop.f32.mrf.mxu1 }
 0x102   : > { %728 = vst [vmem:[%s1156_s19 + $0x40] sm:$0xff] %v696_v63  ;;  %744 = vst [vmem:[%s1156_s19 + $0xc0] sm:$0xff] %v712_v0  ;;  %v699_v3 = vadd.f32 %v952_v1, %v1151_v24  ;;  %v715_v4 = vadd.f32 %v968_v2, %v1151_v24 }
 0x103   : > { %v596_v5 = vpop.f32.mrf.mxu0  ;;  %v660_v6 = vpop.f32.mrf.mxu1 }
 0x104   : > { %731 = vst [vmem:[%s1156_s19 + $0x58] sm:$0xff] %v699_v3  ;;  %747 = vst [vmem:[%s1156_s19 + $0xd8] sm:$0xff] %v715_v4  ;;  %v697_v7 = vadd.f32 %v1151_v24, %v596_v5  ;;  %v713_v8 = vadd.f32 %v1151_v24, %v660_v6 }
 0x105   : > { %v955_v9 = vpop.f32.mrf.mxu0  ;;  %v971_v10 = vpop.f32.mrf.mxu1 }
 0x106   : > { %729 = vst [vmem:[%s1156_s19 + $0x48] sm:$0xff] %v697_v7  ;;  %745 = vst [vmem:[%s1156_s19 + $0xc8] sm:$0xff] %v713_v8  ;;  %v702_v11 = vadd.f32 %v955_v9, %v1151_v24  ;;  %v718_v12 = vadd.f32 %v971_v10, %v1151_v24 }
 0x107   : > { %v609_v13 = vpop.f32.mrf.mxu0  ;;  %v673_v14 = vpop.f32.mrf.mxu1 }
 0x108   : > { %734 = vst [vmem:[%s1156_s19 + $0x70] sm:$0xff] %v702_v11  ;;  %750 = vst [vmem:[%s1156_s19 + $0xf0] sm:$0xff] %v718_v12  ;;  %v700_v15 = vadd.f32 %v1151_v24, %v609_v13  ;;  %v716_v16 = vadd.f32 %v1151_v24, %v673_v14 }
 0x109   : > { %v956_v17 = vpop.f32.mrf.mxu0  ;;  %v972_v18 = vpop.f32.mrf.mxu1 }
 0x10a   : > { %732 = vst [vmem:[%s1156_s19 + $0x60] sm:$0xff] %v700_v15  ;;  %748 = vst [vmem:[%s1156_s19 + $0xe0] sm:$0xff] %v716_v16  ;;  %v703_v19 = vadd.f32 %v956_v17, %v1151_v24  ;;  %v719_v20 = vadd.f32 %v972_v18, %v1151_v24 }
 0x10b   : > { %v612_v21 = vpop.f32.mrf.mxu0  ;;  %v676_v22 = vpop.f32.mrf.mxu1 }
 0x10c   : > { %735 = vst [vmem:[%s1156_s19 + $0x78] sm:$0xff] %v703_v19  ;;  %751 = vst [vmem:[%s1156_s19 + $0xf8] sm:$0xff] %v719_v20  ;;  %v701_v23 = vadd.f32 %v1151_v24, %v612_v21  ;;  %v717_v25 = vadd.f32 %v1151_v24, %v676_v22 }
 0x10e   : > { %733 = vst [vmem:[%s1156_s19 + $0x68] sm:$0xff] %v701_v23  ;;  %749 = vst [vmem:[%s1156_s19 + $0xe8] sm:$0xff] %v717_v25 }
 0x10f PF: > { %s13_s14 = sadd.s32 1, %s1059_s14   ;;  %s1235_s12 = smov %s1055_s13 }
 0x110   : > { %p10_p5 = scmp.ge.s32.totalorder %s13_s14, 4   ;;  %s1236_s13 = smov %s1238_s15 }
 0x112   :  { %12 = sbr.rel (!%p10_p5) target bundleno = 2 (0x2), region = 72 }

</bundles_post_ra>
